<compile_context>
chip_gen: v5e
topology: v5e:2x2
jax: 0.10.0
libtpu: 0.0.40
codegen_flags: <defaults>
</compile_context>

<pallas_src>
import jax
import jax.numpy as jnp
from jax import lax
from jax.experimental import pallas as pl
from jax.experimental.pallas import tpu as pltpu


EMBED_DIM = 32
H1 = 64
H2 = 32


def _round_up(x, m):
    return (x + m - 1) // m * m


def _cdiv(a, b):
    return (a + b - 1) // b


# ---------------------------------------------------------------------------
# Kernels
# ---------------------------------------------------------------------------
def _mlp_tail(u, it, w1u_ref, w1i_ref, b1_ref, w2_ref, b2_ref, w3_ref, b3_ref,
              o_ref):
    """Shared MLP tail:
         h1 = relu(u @ w1u + it @ w1i + b1)   (TB, H1)  f32 accumulate
         h2 = relu(h1 @ w2 + b2)              (TB, H2)
         o  = w3 @ h2^T + b3                  (1, TB)   lane-dense store
    """
    h1 = jnp.dot(u, w1u_ref[...], preferred_element_type=jnp.float32)
    h1 = h1 + jnp.dot(it, w1i_ref[...], preferred_element_type=jnp.float32)
    h1 = jnp.maximum(h1 + b1_ref[...], 0.0).astype(w2_ref.dtype)

    h2 = jnp.dot(h1, w2_ref[...], preferred_element_type=jnp.float32)
    h2 = jnp.maximum(h2 + b2_ref[...], 0.0).astype(w3_ref.dtype)

    # (1, H2) x (TB, H2)^T so the batch lands on the lane axis -> unmasked
    # lane-dense output store instead of a masked (TB, 1) column store.
    out = lax.dot_general(w3_ref[...], h2,
                          dimension_numbers=(((1,), (1,)), ((), ())),
                          preferred_element_type=jnp.float32)        # (1, TB)
    o_ref[...] = (out + b3_ref[...]).astype(o_ref.dtype)


def ncf_fused_gather_kernel(uidx_ref, iidx_ref, utab_ref, itab_ref,
                            w1u_ref, w1i_ref, b1_ref, w2_ref, b2_ref,
                            w3_ref, b3_ref, o_ref):
    """Fused embedding gather (one-hot @ table on the MXU) + MLP."""
    tb = uidx_ref.shape[0]
    nu = utab_ref.shape[0]
    ni = itab_ref.shape[0]

    uidx = uidx_ref[...]                                   # (TB, 1) int32
    iidx = iidx_ref[...]                                   # (TB, 1) int32

    one_u = (uidx == lax.broadcasted_iota(jnp.int32, (tb, nu), 1)
             ).astype(utab_ref.dtype)                      # (TB, Nu) one-hot
    one_i = (iidx == lax.broadcasted_iota(jnp.int32, (tb, ni), 1)
             ).astype(itab_ref.dtype)                      # (TB, Ni) one-hot

    # One-hot x bf16 rows with f32 accumulation is exact, so this matches a
    # row gather from the bf16 table bit-for-bit.
    u = jnp.dot(one_u, utab_ref[...],
                preferred_element_type=jnp.float32).astype(w1u_ref.dtype)
    it = jnp.dot(one_i, itab_ref[...],
                 preferred_element_type=jnp.float32).astype(w1i_ref.dtype)

    _mlp_tail(u, it, w1u_ref, w1i_ref, b1_ref, w2_ref, b2_ref, w3_ref, b3_ref,
              o_ref)


def ncf_vec_kernel(u_ref, i_ref, w1u_ref, w1i_ref, b1_ref, w2_ref, b2_ref,
                   w3_ref, b3_ref, o_ref):
    """Fallback: embedding rows already gathered (large-table path)."""
    _mlp_tail(u_ref[...], i_ref[...], w1u_ref, w1i_ref, b1_ref, w2_ref,
              b2_ref, w3_ref, b3_ref, o_ref)


# ---------------------------------------------------------------------------
# Parameters
# ---------------------------------------------------------------------------
def init_params(key, num_users, num_items, embedding_dim=EMBED_DIM):
    """Deterministic f32 parameter init mirroring the PyTorch module's shapes."""
    ks = jax.random.split(key, 8)

    def _lin(kw, kb, fan_in, fan_out):
        bound = 1.0 / jnp.sqrt(fan_in)
        w = jax.random.uniform(kw, (fan_in, fan_out), jnp.float32, -bound, bound)
        b = jax.random.uniform(kb, (1, fan_out), jnp.float32, -bound, bound)
        return w, b

    params = {}
    # nn.Embedding default init: N(0, 1)
    params["user_emb"] = jax.random.normal(
        ks[0], (num_users + 1, embedding_dim), jnp.float32)
    params["item_emb"] = jax.random.normal(
        ks[1], (num_items + 1, embedding_dim), jnp.float32)
    params["w1"], params["b1"] = _lin(ks[2], ks[3], embedding_dim * 2, H1)
    params["w2"], params["b2"] = _lin(ks[4], ks[5], H1, H2)
    params["w3"], params["b3"] = _lin(ks[6], ks[7], H2, 1)
    return params


def prepare_params(params, compute_dtype=jnp.bfloat16):
    """One-time inference prep: cast to compute dtype, pad table rows, split w1.

    Done once (outside the per-call forward) so the full-table bf16 cast is
    not a per-call HBM pass.
    """
    emb_dim = params["user_emb"].shape[1]

    def _pad_rows(tab):
        n = tab.shape[0]
        return jnp.pad(tab, ((0, _round_up(n, 128) - n), (0, 0)))

    return {
        "user_tab": _pad_rows(params["user_emb"]).astype(compute_dtype),
        "item_tab": _pad_rows(params["item_emb"]).astype(compute_dtype),
        "w1u": params["w1"][:emb_dim].astype(compute_dtype),       # (E, H1)
        "w1i": params["w1"][emb_dim:].astype(compute_dtype),       # (E, H1)
        "b1": params["b1"].astype(jnp.float32),                    # (1, H1)
        "w2": params["w2"].astype(compute_dtype),                  # (H1, H2)
        "b2": params["b2"].astype(jnp.float32),                    # (1, H2)
        "w3": params["w3"].reshape(1, -1).astype(compute_dtype),   # (1, H2)
        "b3": params["b3"].astype(jnp.float32),                    # (1, 1)
    }


# ---------------------------------------------------------------------------
# Forward
# ---------------------------------------------------------------------------
def neural_cf_forward(prep, user, item, *, block_b=4096,
                      fused_gather_vmem_budget=6 * 1024 * 1024):
    """Forward pass equivalent to NeuralCF.forward(user, item)."""
    emb_dim, h1 = prep["w1u"].shape
    h2 = prep["w2"].shape[1]
    B = user.shape[0]

    # --- batch tiling ------------------------------------------------------
    # Big tiles amortize the ~0.35us/grid-step overhead; keep >= 2 tiles when
    # the padded batch allows it so ("parallel",) can shard across both TCs
    # on v7x.
    Bp0 = _round_up(B, 128)
    max_tb = max(128, _round_up(block_b, 128))
    num_tiles = _cdiv(Bp0, max_tb)
    if Bp0 >= 256:
        num_tiles = max(num_tiles, 2)
    tb = _round_up(_cdiv(Bp0, num_tiles), 128)
    Bp = tb * num_tiles

    # Pad the *indices* (row 0 is always valid in the (num+1)-row tables), not
    # any (Bp, E) activation slab; padded rows are sliced off at the end.
    user_p = jnp.pad(user.astype(jnp.int32), (0, Bp - B)).reshape(Bp, 1)
    item_p = jnp.pad(item.astype(jnp.int32), (0, Bp - B)).reshape(Bp, 1)

    nu = prep["user_tab"].shape[0]
    ni = prep["item_tab"].shape[0]
    ebytes = jnp.dtype(prep["user_tab"].dtype).itemsize

    # Fuse the gather when the tables + the (tb, Nu/Ni) one-hot intermediates
    # comfortably fit VMEM (true here; real NCF tables with millions of rows
    # take the fallback path below).
    fused = ((nu + ni) * (tb + emb_dim) * ebytes) <= fused_gather_vmem_budget

    def const_spec(shape):
        return pl.BlockSpec(shape, lambda i: (0,) * len(shape))

    weight_specs = [
        const_spec((emb_dim, h1)),    # w1 (user half)
        const_spec((emb_dim, h1)),    # w1 (item half)
        const_spec((1, h1)),          # b1
        const_spec((h1, h2)),         # w2
        const_spec((1, h2)),          # b2
        const_spec((1, h2)),          # w3 as a row
        const_spec((1, 1)),           # b3
    ]
    weight_args = (prep["w1u"], prep["w1i"], prep["b1"], prep["w2"],
                   prep["b2"], prep["w3"], prep["b3"])
    out_shape = jax.ShapeDtypeStruct((1, Bp), jnp.float32)
    out_spec = pl.BlockSpec((1, tb), lambda i: (0, i))
    cparams = pltpu.CompilerParams(dimension_semantics=("parallel",))

    if fused:
        out = pl.pallas_call(
            ncf_fused_gather_kernel,
            out_shape=out_shape,
            grid=(num_tiles,),
            in_specs=[
                pl.BlockSpec((tb, 1), lambda i: (i, 0)),   # user indices
                pl.BlockSpec((tb, 1), lambda i: (i, 0)),   # item indices
                const_spec((nu, emb_dim)),                 # user table (VMEM)
                const_spec((ni, emb_dim)),                 # item table (VMEM)
            ] + weight_specs,
            out_specs=out_spec,
            compiler_params=cparams,
        )(user_p, item_p, prep["user_tab"], prep["item_tab"], *weight_args)
    else:
        # TODO(synk): large-table path should DMA-gather the tile's rows from
        # pl.ANY-space tables inside the kernel (double-buffered) instead of
        # this XLA-side take(); tables are already pre-cast, so at least no
        # per-call full-table pass happens here.
        u_vec = jnp.take(prep["user_tab"], user_p[:, 0], axis=0)
        i_vec = jnp.take(prep["item_tab"], item_p[:, 0], axis=0)
        out = pl.pallas_call(
            ncf_vec_kernel,
            out_shape=out_shape,
            grid=(num_tiles,),
            in_specs=[
                pl.BlockSpec((tb, emb_dim), lambda i: (i, 0)),
                pl.BlockSpec((tb, emb_dim), lambda i: (i, 0)),
            ] + weight_specs,
            out_specs=out_spec,
            compiler_params=cparams,
        )(u_vec, i_vec, *weight_args)

    # torch .squeeze() on (B, 1) -> (B,); drop batch padding.
    return out.reshape(Bp)[:B]


# ---------------------------------------------------------------------------
# References
# ---------------------------------------------------------------------------
def neural_cf_reference(params, user, item):
    """Pure-f32 JAX reference matching the PyTorch module exactly."""
    user_vec = jnp.take(params["user_emb"], user, axis=0)
    item_vec = jnp.take(params["item_emb"], item, axis=0)
    x = jnp.concatenate([user_vec, item_vec], axis=-1)
    h1 = jnp.maximum(x @ params["w1"] + params["b1"], 0.0)
    h2 = jnp.maximum(h1 @ params["w2"] + params["b2"], 0.0)
    return jnp.squeeze(h2 @ params["w3"] + params["b3"], axis=-1)


def neural_cf_reference_bf16(params, user, item):
    """Reference with the kernel's precision recipe (bf16 operands, f32 acc)."""
    cd = jnp.bfloat16
    E = params["user_emb"].shape[1]
    uv = jnp.take(params["user_emb"].astype(cd), user, axis=0)
    iv = jnp.take(params["item_emb"].astype(cd), item, axis=0)
    h1 = (jnp.dot(uv, params["w1"][:E].astype(cd), preferred_element_type=jnp.float32)
          + jnp.dot(iv, params["w1"][E:].astype(cd), preferred_element_type=jnp.float32)
          + params["b1"])
    h1 = jnp.maximum(h1, 0.0).astype(cd)
    h2 = jnp.dot(h1, params["w2"].astype(cd),
                 preferred_element_type=jnp.float32) + params["b2"]
    h2 = jnp.maximum(h2, 0.0).astype(cd)
    out = jnp.dot(h2, params["w3"].astype(cd),
                  preferred_element_type=jnp.float32) + params["b3"]
    return jnp.squeeze(out, axis=-1)


if __name__ == "__main__":
    num_users, num_items = 50, 40

    key = jax.random.PRNGKey(0)
    k_param, k_user, k_item, k_user2, k_item2 = jax.random.split(key, 5)

    params = init_params(k_param, num_users, num_items)
    prep = prepare_params(params)      # one-time bf16 cast / split / row pad

    forward = jax.jit(neural_cf_forward)

    # Small batch (single tile, fused in-kernel gather).
    batch = 8
    user = jax.random.randint(k_user, (batch,), 0, num_users + 1, dtype=jnp.int32)
    item = jax.random.randint(k_item, (batch,), 0, num_items + 1, dtype=jnp.int32)
    out = jax.block_until_ready(forward(prep, user, item))
    assert out.shape == (batch,), out.shape

    # Tight check against a reference using the same precision recipe.
    ref_bf16 = neural_cf_reference_bf16(params, user, item)
    assert jnp.allclose(out, ref_bf16, atol=1e-3, rtol=1e-3), (out, ref_bf16)
    # Looser check against the full-f32 PyTorch-equivalent math.
    ref_f32 = neural_cf_reference(params, user, item)
    assert jnp.allclose(out, ref_f32, atol=5e-2, rtol=5e-2), (out, ref_f32)

    # Larger batch exercising the >=2-tile (v7x-megacore-friendly) path and
    # batch padding.
    batch2 = 384
    user2 = jax.random.randint(k_user2, (batch2,), 0, num_users + 1, dtype=jnp.int32)
    item2 = jax.random.randint(k_item2, (batch2,), 0, num_items + 1, dtype=jnp.int32)
    out2 = jax.block_until_ready(forward(prep, user2, item2))
    assert out2.shape == (batch2,), out2.shape
    ref2 = neural_cf_reference_bf16(params, user2, item2)
    assert jnp.allclose(out2, ref2, atol=1e-3, rtol=1e-3), (out2, ref2)

    print("KERNEL_OK")
</pallas_src>

<mosaic_0001>
module attributes {stable_mosaic.version = 11 : i64} {
  func.func @ncf_fused_gather_kernel(%arg0: i32, %arg1: memref<128x1xi32, #tpu.memory_space<vmem>>, %arg2: memref<128x1xi32, #tpu.memory_space<vmem>>, %arg3: memref<128x32xbf16, #tpu.memory_space<vmem>>, %arg4: memref<128x32xbf16, #tpu.memory_space<vmem>>, %arg5: memref<32x64xbf16, #tpu.memory_space<vmem>>, %arg6: memref<32x64xbf16, #tpu.memory_space<vmem>>, %arg7: memref<1x64xf32, #tpu.memory_space<vmem>>, %arg8: memref<64x32xbf16, #tpu.memory_space<vmem>>, %arg9: memref<1x32xf32, #tpu.memory_space<vmem>>, %arg10: memref<1x32xbf16, #tpu.memory_space<vmem>>, %arg11: memref<1x1xf32, #tpu.memory_space<vmem>>, %arg12: memref<1x128xf32, #tpu.memory_space<vmem>>) attributes {dimension_semantics = [#tpu.dimension_semantics<parallel>], iteration_bounds = array<i64: 1>, scalar_prefetch = 0 : i64, scratch_operands = 0 : i64, tpu.core_type = #tpu.core_type<tc>, window_params = [{transform_indices = @transform_0, window_bounds = array<i64: 128, 1>}, {transform_indices = @transform_1, window_bounds = array<i64: 128, 1>}, {pipeline_mode = #tpu.pipeline_mode<synchronous>, transform_indices = @transform_2, window_bounds = array<i64: 128, 32>}, {pipeline_mode = #tpu.pipeline_mode<synchronous>, transform_indices = @transform_3, window_bounds = array<i64: 128, 32>}, {pipeline_mode = #tpu.pipeline_mode<synchronous>, transform_indices = @transform_4, window_bounds = array<i64: 32, 64>}, {pipeline_mode = #tpu.pipeline_mode<synchronous>, transform_indices = @transform_5, window_bounds = array<i64: 32, 64>}, {pipeline_mode = #tpu.pipeline_mode<synchronous>, transform_indices = @transform_6, window_bounds = array<i64: 1, 64>}, {pipeline_mode = #tpu.pipeline_mode<synchronous>, transform_indices = @transform_7, window_bounds = array<i64: 64, 32>}, {pipeline_mode = #tpu.pipeline_mode<synchronous>, transform_indices = @transform_8, window_bounds = array<i64: 1, 32>}, {pipeline_mode = #tpu.pipeline_mode<synchronous>, transform_indices = @transform_9, window_bounds = array<i64: 1, 32>}, {pipeline_mode = #tpu.pipeline_mode<synchronous>, transform_indices = @transform_10, window_bounds = array<i64: 1, 1>}, {transform_indices = @transform_11, window_bounds = array<i64: 1, 128>}]} {
    %c0 = arith.constant 0 : index
    %c0_0 = arith.constant 0 : index
    %0 = vector.load %arg1[%c0, %c0_0] : memref<128x1xi32, #tpu.memory_space<vmem>>, vector<128x1xi32>
    %c0_1 = arith.constant 0 : index
    %c0_2 = arith.constant 0 : index
    %1 = vector.load %arg2[%c0_1, %c0_2] : memref<128x1xi32, #tpu.memory_space<vmem>>, vector<128x1xi32>
    %2 = tpu.iota {dimensions = array<i32: 1>} : vector<128x128xi32>
    %3 = vector.broadcast %0 : vector<128x1xi32> to vector<128x128xi32>
    %4 = arith.cmpi eq, %3, %2 : vector<128x128xi32>
    %5 = arith.extui %4 : vector<128x128xi1> to vector<128x128xi32>
    %6 = arith.sitofp %5 : vector<128x128xi32> to vector<128x128xf32>
    %7 = arith.truncf %6 : vector<128x128xf32> to vector<128x128xbf16>
    %8 = tpu.iota {dimensions = array<i32: 1>} : vector<128x128xi32>
    %9 = vector.broadcast %1 : vector<128x1xi32> to vector<128x128xi32>
    %10 = arith.cmpi eq, %9, %8 : vector<128x128xi32>
    %11 = arith.extui %10 : vector<128x128xi1> to vector<128x128xi32>
    %12 = arith.sitofp %11 : vector<128x128xi32> to vector<128x128xf32>
    %13 = arith.truncf %12 : vector<128x128xf32> to vector<128x128xbf16>
    %c0_3 = arith.constant 0 : index
    %c0_4 = arith.constant 0 : index
    %14 = vector.load %arg3[%c0_3, %c0_4] : memref<128x32xbf16, #tpu.memory_space<vmem>>, vector<128x32xbf16>
    %cst = arith.constant dense<0.000000e+00> : vector<128x32xf32>
    %15 = tpu.matmul %7, %14, %cst {dimension_numbers = #tpu.dot_dimension_numbers<[1], [0], [0], [1], [0, 0, 1, 1], [], []>} : vector<128x128xbf16>, vector<128x32xbf16>, vector<128x32xf32> -> vector<128x32xf32>
    %16 = arith.truncf %15 : vector<128x32xf32> to vector<128x32xbf16>
    %c0_5 = arith.constant 0 : index
    %c0_6 = arith.constant 0 : index
    %17 = vector.load %arg4[%c0_5, %c0_6] : memref<128x32xbf16, #tpu.memory_space<vmem>>, vector<128x32xbf16>
    %cst_7 = arith.constant dense<0.000000e+00> : vector<128x32xf32>
    %18 = tpu.matmul %13, %17, %cst_7 {dimension_numbers = #tpu.dot_dimension_numbers<[1], [0], [0], [1], [0, 0, 1, 1], [], []>} : vector<128x128xbf16>, vector<128x32xbf16>, vector<128x32xf32> -> vector<128x32xf32>
    %19 = arith.truncf %18 : vector<128x32xf32> to vector<128x32xbf16>
    %c0_8 = arith.constant 0 : index
    %c0_9 = arith.constant 0 : index
    %20 = vector.load %arg5[%c0_8, %c0_9] : memref<32x64xbf16, #tpu.memory_space<vmem>>, vector<32x64xbf16>
    %cst_10 = arith.constant dense<0.000000e+00> : vector<128x64xf32>
    %21 = tpu.matmul %16, %20, %cst_10 {dimension_numbers = #tpu.dot_dimension_numbers<[1], [0], [0], [1], [0, 0, 1, 1], [], []>} : vector<128x32xbf16>, vector<32x64xbf16>, vector<128x64xf32> -> vector<128x64xf32>
    %c0_11 = arith.constant 0 : index
    %c0_12 = arith.constant 0 : index
    %22 = vector.load %arg6[%c0_11, %c0_12] : memref<32x64xbf16, #tpu.memory_space<vmem>>, vector<32x64xbf16>
    %cst_13 = arith.constant dense<0.000000e+00> : vector<128x64xf32>
    %23 = tpu.matmul %19, %22, %cst_13 {dimension_numbers = #tpu.dot_dimension_numbers<[1], [0], [0], [1], [0, 0, 1, 1], [], []>} : vector<128x32xbf16>, vector<32x64xbf16>, vector<128x64xf32> -> vector<128x64xf32>
    %24 = arith.addf %21, %23 : vector<128x64xf32>
    %c0_14 = arith.constant 0 : index
    %c0_15 = arith.constant 0 : index
    %25 = vector.load %arg7[%c0_14, %c0_15] : memref<1x64xf32, #tpu.memory_space<vmem>>, vector<1x64xf32>
    %26 = vector.broadcast %25 : vector<1x64xf32> to vector<128x64xf32>
    %27 = arith.addf %24, %26 : vector<128x64xf32>
    %cst_16 = arith.constant 0.000000e+00 : f32
    %28 = vector.broadcast %cst_16 : f32 to vector<128x64xf32>
    %29 = arith.maximumf %27, %28 : vector<128x64xf32>
    %30 = arith.truncf %29 : vector<128x64xf32> to vector<128x64xbf16>
    %c0_17 = arith.constant 0 : index
    %c0_18 = arith.constant 0 : index
    %31 = vector.load %arg8[%c0_17, %c0_18] : memref<64x32xbf16, #tpu.memory_space<vmem>>, vector<64x32xbf16>
    %cst_19 = arith.constant dense<0.000000e+00> : vector<128x32xf32>
    %32 = tpu.matmul %30, %31, %cst_19 {dimension_numbers = #tpu.dot_dimension_numbers<[1], [0], [0], [1], [0, 0, 1, 1], [], []>} : vector<128x64xbf16>, vector<64x32xbf16>, vector<128x32xf32> -> vector<128x32xf32>
    %c0_20 = arith.constant 0 : index
    %c0_21 = arith.constant 0 : index
    %33 = vector.load %arg9[%c0_20, %c0_21] : memref<1x32xf32, #tpu.memory_space<vmem>>, vector<1x32xf32>
    %34 = vector.broadcast %33 : vector<1x32xf32> to vector<128x32xf32>
    %35 = arith.addf %32, %34 : vector<128x32xf32>
    %cst_22 = arith.constant 0.000000e+00 : f32
    %36 = vector.broadcast %cst_22 : f32 to vector<128x32xf32>
    %37 = arith.maximumf %35, %36 : vector<128x32xf32>
    %38 = arith.truncf %37 : vector<128x32xf32> to vector<128x32xbf16>
    %c0_23 = arith.constant 0 : index
    %c0_24 = arith.constant 0 : index
    %39 = vector.load %arg10[%c0_23, %c0_24] : memref<1x32xbf16, #tpu.memory_space<vmem>>, vector<1x32xbf16>
    %cst_25 = arith.constant dense<0.000000e+00> : vector<1x128xf32>
    %40 = tpu.matmul %39, %38, %cst_25 {dimension_numbers = #tpu.dot_dimension_numbers<[1], [1], [0], [0], [0, 0, 1, 0], [], []>} : vector<1x32xbf16>, vector<128x32xbf16>, vector<1x128xf32> -> vector<1x128xf32>
    %c0_26 = arith.constant 0 : index
    %c0_27 = arith.constant 0 : index
    %41 = vector.load %arg11[%c0_26, %c0_27] : memref<1x1xf32, #tpu.memory_space<vmem>>, vector<1x1xf32>
    %42 = vector.broadcast %41 : vector<1x1xf32> to vector<1x128xf32>
    %43 = arith.addf %40, %42 : vector<1x128xf32>
    %c0_28 = arith.constant 0 : index
    %c0_29 = arith.constant 0 : index
    %44 = vector.load %arg12[%c0_28, %c0_29] : memref<1x128xf32, #tpu.memory_space<vmem>>, vector<1x128xf32>
    tpu.vector_store %arg12[%c0_28, %c0_29], %43 {strides = array<i32>} : memref<1x128xf32, #tpu.memory_space<vmem>>, vector<1x128xf32>,
    return
  }
  func.func @transform_0(%arg0: i32) -> (i32, i32) {
    %c0_i32 = arith.constant 0 : i32
    %c0_i32_0 = arith.constant 0 : i32
    return %arg0, %c0_i32 : i32, i32
  }
  func.func @transform_1(%arg0: i32) -> (i32, i32) {
    %c0_i32 = arith.constant 0 : i32
    %c0_i32_0 = arith.constant 0 : i32
    return %arg0, %c0_i32 : i32, i32
  }
  func.func @transform_2(%arg0: i32) -> (i32, i32) {
    %c0_i32 = arith.constant 0 : i32
    %c0_i32_0 = arith.constant 0 : i32
    %c0_i32_1 = arith.constant 0 : i32
    return %c0_i32, %c0_i32_0 : i32, i32
  }
  func.func @transform_3(%arg0: i32) -> (i32, i32) {
    %c0_i32 = arith.constant 0 : i32
    %c0_i32_0 = arith.constant 0 : i32
    %c0_i32_1 = arith.constant 0 : i32
    return %c0_i32, %c0_i32_0 : i32, i32
  }
  func.func @transform_4(%arg0: i32) -> (i32, i32) {
    %c0_i32 = arith.constant 0 : i32
    %c0_i32_0 = arith.constant 0 : i32
    %c0_i32_1 = arith.constant 0 : i32
    return %c0_i32, %c0_i32_0 : i32, i32
  }
  func.func @transform_5(%arg0: i32) -> (i32, i32) {
    %c0_i32 = arith.constant 0 : i32
    %c0_i32_0 = arith.constant 0 : i32
    %c0_i32_1 = arith.constant 0 : i32
    return %c0_i32, %c0_i32_0 : i32, i32
  }
  func.func @transform_6(%arg0: i32) -> (i32, i32) {
    %c0_i32 = arith.constant 0 : i32
    %c0_i32_0 = arith.constant 0 : i32
    %c0_i32_1 = arith.constant 0 : i32
    return %c0_i32, %c0_i32_0 : i32, i32
  }
  func.func @transform_7(%arg0: i32) -> (i32, i32) {
    %c0_i32 = arith.constant 0 : i32
    %c0_i32_0 = arith.constant 0 : i32
    %c0_i32_1 = arith.constant 0 : i32
    return %c0_i32, %c0_i32_0 : i32, i32
  }
  func.func @transform_8(%arg0: i32) -> (i32, i32) {
    %c0_i32 = arith.constant 0 : i32
    %c0_i32_0 = arith.constant 0 : i32
    %c0_i32_1 = arith.constant 0 : i32
    return %c0_i32, %c0_i32_0 : i32, i32
  }
  func.func @transform_9(%arg0: i32) -> (i32, i32) {
    %c0_i32 = arith.constant 0 : i32
    %c0_i32_0 = arith.constant 0 : i32
    %c0_i32_1 = arith.constant 0 : i32
    return %c0_i32, %c0_i32_0 : i32, i32
  }
  func.func @transform_10(%arg0: i32) -> (i32, i32) {
    %c0_i32 = arith.constant 0 : i32
    %c0_i32_0 = arith.constant 0 : i32
    %c0_i32_1 = arith.constant 0 : i32
    return %c0_i32, %c0_i32_0 : i32, i32
  }
  func.func @transform_11(%arg0: i32) -> (i32, i32) {
    %c0_i32 = arith.constant 0 : i32
    %c0_i32_0 = arith.constant 0 : i32
    return %c0_i32, %arg0 : i32, i32
  }
}

</mosaic_0001>

<bundles_post_ra>
// kernel: neural_cf_forward.1
= control target key start
LH: loop header
LB: loop body
LE: loop exit
PB: predicated region body
PF: predicated region fallthrough
CT: control target
= control target key end

     0   :  { %v1157_v0 = vmov 0   ;;  %v73_v53 = vlaneseq  ;;  %v1158_v60 = vmov 1.0|1.0   ;;  %s1536_s1 = inlined_call_operand.vmem [shape: s32[128,1], index: 1, kind: input, shape index: {}]   ;;  %s1537_s0 = inlined_call_operand.vmem [shape: s32[128,1], index: 0, kind: input, shape index: {}]   ;;  %s1538_s10 = inlined_call_operand.<no memory space> [shape: f32[1,1], index: 10, kind: input, shape index: {}]   ;;  %s1539_s3 = inlined_call_operand.vmem [shape: bf16[128,32], index: 3, kind: input, shape index: {}]   ;;  %s1540_s2 = inlined_call_operand.vmem [shape: bf16[128,32], index: 2, kind: input, shape index: {}]   ;;  %s1541_s5 = inlined_call_operand.vmem [shape: bf16[32,64], index: 5, kind: input, shape index: {}]   ;;  %s1542_s4 = inlined_call_operand.vmem [shape: bf16[32,64], index: 4, kind: input, shape index: {}]   ;;  %s1543_s6 = inlined_call_operand.vmem [shape: f32[1,64], index: 6, kind: input, shape index: {}]   ;;  %s1544_s7 = inlined_call_operand.vmem [shape: bf16[64,32], index: 7, kind: input, shape index: {}]   ;;  %s1545_s8 = inlined_call_operand.vmem [shape: f32[1,32], index: 8, kind: input, shape index: {}]   ;;  %s1546_s9 = inlined_call_operand.vmem [shape: bf16[1,32], index: 9, kind: input, shape index: {}]   ;;  %s1547_s11 = inlined_call_operand.vmem [shape: f32[1,128], index: 11, kind: output, shape index: {}]  }
   0x1   :  { %1154 = vset.pattern.permute.xlu2 %v1157_v0  ;;  %1153 = vset.pattern.permute.xlu1 %v1157_v0  ;;  %v61_v1 = vld [vmem:[%s1536_s1 + $0x20] sm:$0xff]  ;;  %v59_v2 = vld [vmem:[%s1536_s1 + $0x10] sm:$0xff]  ;;  %v62_v4 = vld [vmem:[%s1536_s1 + $0x28] sm:$0xff]  ;;  %v16_v19 = vstv %s1538_s10 }
   0x2   :  { %v57_v3 = vld [vmem:[%s1536_s1] sm:$0xff]  ;;  %1152 = vset.pattern.permute.xlu0 %v1157_v0  ;;  %192 = vperm.xlu2 %1154, %v61_v1   ;;  %v60_v5 = vld [vmem:[%s1536_s1 + $0x18] sm:$0xff]  ;;  %v58_v6 = vld [vmem:[%s1536_s1 + $0x8] sm:$0xff]  ;;  %17 = vst [vmem:[#allocation2] sm:$0x1] %v16_v19  ;;  %v1366_v56 = vand.u32 127, %v73_v53 }
   0x3   :  { %186 = vperm.xlu1 %1153, %v59_v2   ;;  %180 = vperm.xlu0 %1152, %v57_v3   ;;  %v65_v7 = vld [vmem:[%s1536_s1 + $0x40] sm:$0xff]  ;;  %v64_v8 = vld [vmem:[%s1536_s1 + $0x38] sm:$0xff]  ;;  %v63_v9 = vld [vmem:[%s1536_s1 + $0x30] sm:$0xff] }
   0x4   :  { %v68_v10 = vld [vmem:[%s1536_s1 + $0x58] sm:$0xff]  ;;  %v67_v11 = vld [vmem:[%s1536_s1 + $0x50] sm:$0xff]  ;;  %v66_v12 = vld [vmem:[%s1536_s1 + $0x48] sm:$0xff] }
   0x5   :  { %v71_v13 = vld [vmem:[%s1536_s1 + $0x70] sm:$0xff]  ;;  %v70_v14 = vld [vmem:[%s1536_s1 + $0x68] sm:$0xff]  ;;  %v69_v15 = vld [vmem:[%s1536_s1 + $0x60] sm:$0xff] }
   0x6   :  { %v42_v16 = vld [vmem:[%s1537_s0 + $0x8] sm:$0xff]  ;;  %v72_v17 = vld [vmem:[%s1536_s1 + $0x78] sm:$0xff]  ;;  %v41_v18 = vld [vmem:[%s1537_s0] sm:$0xff] }
   0x7   :  { %v45_v20 = vld [vmem:[%s1537_s0 + $0x20] sm:$0xff]  ;;  %v43_v21 = vld [vmem:[%s1537_s0 + $0x10] sm:$0xff]  ;;  %v44_v22 = vld [vmem:[%s1537_s0 + $0x18] sm:$0xff] }
   0x8   :  { %v48_v23 = vld [vmem:[%s1537_s0 + $0x38] sm:$0xff]  ;;  %v46_v24 = vld [vmem:[%s1537_s0 + $0x28] sm:$0xff]  ;;  %v47_v25 = vld [vmem:[%s1537_s0 + $0x30] sm:$0xff] }
   0x9   :  { %v1135_v26 = vld [vmem:[%s1539_s3 + $0x38] sm:$0xff]  ;;  %v51_v27 = vld [vmem:[%s1537_s0 + $0x50] sm:$0xff]  ;;  %v49_v28 = vld [vmem:[%s1537_s0 + $0x40] sm:$0xff] }
   0xa   :  { %195 = vperm.xlu2 %1154, %v62_v4   ;;  %468 = vmatpush.bf16.msra.mxu1 %v1135_v26  ;;  %v50_v29 = vld [vmem:[%s1537_s0 + $0x48] sm:$0xff]  ;;  %v1134_v30 = vld [vmem:[%s1539_s3 + $0x30] sm:$0xff]  ;;  %v52_v33 = vld [vmem:[%s1537_s0 + $0x58] sm:$0xff] }
   0xb   :  { %189 = vperm.xlu1 %1153, %v60_v5   ;;  %183 = vperm.xlu0 %1152, %v58_v6   ;;  %v1133_v31 = vld [vmem:[%s1539_s3 + $0x28] sm:$0xff]  ;;  %v53_v34 = vld [vmem:[%s1537_s0 + $0x60] sm:$0xff]  ;;  %v1131_v36 = vld [vmem:[%s1539_s3 + $0x18] sm:$0xff] }
   0xc   :  { %v54_v32 = vld [vmem:[%s1537_s0 + $0x68] sm:$0xff]  ;;  %v1132_v35 = vld [vmem:[%s1539_s3 + $0x20] sm:$0xff]  ;;  %v55_v38 = vld [vmem:[%s1537_s0 + $0x70] sm:$0xff] }
   0xd   :  { %v883_v37 = vld [vmem:[#allocation2] sm:$0x1]  ;;  %v56_v39 = vld [vmem:[%s1537_s0 + $0x78] sm:$0xff]  ;;  %v1130_v40 = vld [vmem:[%s1539_s3 + $0x10] sm:$0xff] }
   0xe   :  { %469 = vmatpush.bf16.msra.mxu1 %v1134_v30  ;;  %v1129_v41 = vld [vmem:[%s1539_s3 + $0x8] sm:$0xff]  ;;  %v1128_v42 = vld [vmem:[%s1539_s3] sm:$0xff]  ;;  %v1127_v43 = vld [vmem:[%s1540_s2 + $0x38] sm:$0xff] }
   0xf   :  { %347 = vmatpush.bf16.msra.mxu0 %v1127_v43  ;;  %v1126_v44 = vld [vmem:[%s1540_s2 + $0x30] sm:$0xff]  ;;  %v1125_v45 = vld [vmem:[%s1540_s2 + $0x28] sm:$0xff]  ;;  %v1124_v46 = vld [vmem:[%s1540_s2 + $0x20] sm:$0xff] }
  0x10   :  { %v1123_v48 = vld [vmem:[%s1540_s2 + $0x18] sm:$0xff]  ;;  %v1122_v49 = vld [vmem:[%s1540_s2 + $0x10] sm:$0xff]  ;;  %v1121_v54 = vld [vmem:[%s1540_s2 + $0x8] sm:$0xff] }
  0x11   :  { %v1120_v55 = vld [vmem:[%s1540_s2] sm:$0xff] }
  0x12   :  { %204 = vperm.xlu2 %1154, %v65_v7   ;;  %470 = vmatpush.bf16.msra.mxu1 %v1133_v31 }
  0x13   :  { %201 = vperm.xlu1 %1153, %v64_v8   ;;  %198 = vperm.xlu0 %1152, %v63_v9  }
  0x14   :  { %348 = vmatpush.bf16.msra.mxu0 %v1126_v44 }
  0x16   :  { %471 = vmatpush.bf16.msra.mxu1 %v1132_v35 }
  0x18   :  { %349 = vmatpush.bf16.msra.mxu0 %v1125_v45 }
  0x1a   :  { %213 = vperm.xlu2 %1154, %v68_v10   ;;  %472 = vmatpush.bf16.msra.mxu1 %v1131_v36 }
  0x1b   :  { %210 = vperm.xlu1 %1153, %v67_v11   ;;  %207 = vperm.xlu0 %1152, %v66_v12  }
  0x1c   :  { %350 = vmatpush.bf16.msra.mxu0 %v1124_v46 }
  0x1e   :  { %473 = vmatpush.bf16.msra.mxu1 %v1130_v40 }
  0x20   :  { %351 = vmatpush.bf16.msra.mxu0 %v1123_v48  ;;  %v1136_v48 = vld [vmem:[%s1542_s4] sm:$0xff] }
  0x22   :  { %222 = vperm.xlu2 %1154, %v71_v13   ;;  %474 = vmatpush.bf16.msra.mxu1 %v1129_v41 }
  0x23   :  { %219 = vperm.xlu1 %1153, %v70_v14   ;;  %216 = vperm.xlu0 %1152, %v69_v15  }
  0x24   :  { %352 = vmatpush.bf16.msra.mxu0 %v1122_v49 }
  0x26   :  { %475 = vmatpush.bf16.msra.mxu1 %v1128_v42 }
  0x28   :  { %353 = vmatpush.bf16.msra.mxu0 %v1121_v54 }
  0x2a   :  { %79 = vperm.xlu2 %1154, %v42_v16  }
  0x2b   :  { %225 = vperm.xlu0 %1152, %v72_v17   ;;  %76 = vperm.xlu1 %1153, %v41_v18  }
  0x2c   :  { %354 = vmatpush.bf16.msra.mxu0 %v1120_v55 }
  0x32   :  { %88 = vperm.xlu2 %1154, %v45_v20  }
  0x33   :  { %82 = vperm.xlu0 %1152, %v43_v21   ;;  %85 = vperm.xlu1 %1153, %v44_v22   ;;  %v1139_v21 = vld [vmem:[%s1541_s5 + $0x8] sm:$0xff]  ;;  %v1138_v22 = vld [vmem:[%s1541_s5] sm:$0xff] }
  0x34   :  { %1144 = vmatpush.bf16.msrb.mxu1 %v1139_v21  ;;  %576 = vmatpush.bf16.msrb.mxu0 %v1139_v21 }
  0x35   :  { %1145 = vmatpush.bf16.msra.mxu2 %v1139_v21  ;;  %1146 = vmatpush.bf16.msra.mxu3 %v1139_v21 }
  0x38   :  { %1147 = vmatpush.bf16.msrb.mxu1 %v1138_v22  ;;  %577 = vmatpush.bf16.msrb.mxu0 %v1138_v22 }
  0x39   :  { %1148 = vmatpush.bf16.msra.mxu2 %v1138_v22  ;;  %1149 = vmatpush.bf16.msra.mxu3 %v1138_v22 }
  0x3a   :  { %97 = vperm.xlu2 %1154, %v48_v23  }
  0x3b   :  { %91 = vperm.xlu0 %1152, %v46_v24   ;;  %94 = vperm.xlu1 %1153, %v47_v25  }
  0x42   :  { %106 = vperm.xlu2 %1154, %v51_v27  }
  0x43   :  { %100 = vperm.xlu0 %1152, %v49_v28   ;;  %103 = vperm.xlu1 %1153, %v50_v29  }
  0x4a   :  { %115 = vperm.xlu2 %1154, %v54_v32  }
  0x4b   :  { %109 = vperm.xlu0 %1152, %v52_v33   ;;  %112 = vperm.xlu1 %1153, %v53_v34  }
  0x52   :  { %886 = vperm.xlu2 %1154, %v883_v37  }
  0x53   :  { %118 = vperm.xlu0 %1152, %v55_v38   ;;  %121 = vperm.xlu1 %1153, %v56_v39  }
  0x5c   :  { %v193_v47 = vpop.permute.xlu2 %192 }
  0x5d   :  { %vm231_vm12 = vcmp.eq.s32.totalorder %v193_v47, %v1366_v56  ;;  %v1137_v47 = vld [vmem:[%s1542_s4 + $0x8] sm:$0xff] }
  0x5e   :  { %661 = vmatpush.bf16.msrb.mxu3 %v1137_v47 }
  0x62   :  { %662 = vmatpush.bf16.msrb.mxu3 %v1136_v48 }
  0x64   :  { %v196_v52 = vpop.permute.xlu2 %195 }
  0x65   :  { %vm232_vm13 = vcmp.eq.s32.totalorder %v196_v52, %v1366_v56 }
  0x66   :  { %vm1051_vm14 = vmpackc.low %vm232_vm13, %vm231_vm12 }
  0x6c   :  { %v205_v59 = vpop.permute.xlu2 %204 }
  0x6d   :  { %vm235_vm13 = vcmp.eq.s32.totalorder %v205_v59, %v1366_v56 }
  0x74   :  { %v214_v63 = vpop.permute.xlu2 %213 }
  0x75   :  { %v187_v50 = vpop.permute.xlu1 %186  ;;  %v181_v51 = vpop.permute.xlu0 %180  ;;  %vm238_vm3 = vcmp.eq.s32.totalorder %v214_v63, %v1366_v56 }
  0x76   :  { %vm227_vm1 = vcmp.eq.s32.totalorder %v181_v51, %v1366_v56  ;;  %vm229_vm4 = vcmp.eq.s32.totalorder %v187_v50, %v1366_v56 }
  0x7c   :  { %v223_v3 = vpop.permute.xlu2 %222 }
  0x7d   :  { %v190_v57 = vpop.permute.xlu1 %189  ;;  %v184_v58 = vpop.permute.xlu0 %183  ;;  %vm241_vm15 = vcmp.eq.s32.totalorder %v223_v3, %v1366_v56 }
  0x7e   :  { %vm228_vm0 = vcmp.eq.s32.totalorder %v184_v58, %v1366_v56  ;;  %vm230_vm5 = vcmp.eq.s32.totalorder %v190_v57, %v1366_v56 }
  0x7f   :  { %vm1047_vm2 = vmpackc.low %vm228_vm0, %vm227_vm1 }
  0x80   :  { %1048 = vmatmul.msk.bf16.vlgmr.msra.gmra.mxu1 %vm1047_vm2, %v1158_v60  ;;  %vm1049_vm8 = vmpackc.low %vm230_vm5, %vm229_vm4 }
  0x84   :  { %v80_v9 = vpop.permute.xlu2 %79 }
  0x85   :  { %v202_v61 = vpop.permute.xlu1 %201  ;;  %v199_v62 = vpop.permute.xlu0 %198  ;;  %vm124_vm2 = vcmp.eq.s32.totalorder %v80_v9, %v1366_v56 }
  0x86   :  { %vm234_vm5 = vcmp.eq.s32.totalorder %v202_v61, %v1366_v56 }
  0x8c   :  { %v89_v14 = vpop.permute.xlu2 %88 }
  0x8d   :  { %v211_v0 = vpop.permute.xlu1 %210  ;;  %v208_v1 = vpop.permute.xlu0 %207 }
  0x8e   :  { %vm237_vm6 = vcmp.eq.s32.totalorder %v211_v0, %v1366_v56 }
  0x8f   :  { %vm1375_vm7 = vmpackc.low %vm238_vm3, %vm237_vm6  ;;  %vm233_vm6 = vcmp.eq.s32.totalorder %v199_v62, %v1366_v56 }
  0x90   :  { %1050 = vmatmul.msk.bf16.gmra.mxu1 %vm1049_vm8, %v1158_v60 }
  0x94   :  { %v98_v16 = vpop.permute.xlu2 %97 }
  0x95   :  { %v220_v4 = vpop.permute.xlu1 %219  ;;  %v217_v5 = vpop.permute.xlu0 %216 }
  0x96   :  { %vm240_vm9 = vcmp.eq.s32.totalorder %v220_v4, %v1366_v56  ;;  %vm239_vm10 = vcmp.eq.s32.totalorder %v217_v5, %v1366_v56 }
  0x97   :  { %vm1382_vm11 = vmpackc.low %vm240_vm9, %vm239_vm10 }
  0x98   :  { %vm1053_vm10 = vmpackc.low %vm234_vm5, %vm233_vm6  ;;  %vm130_vm5 = vcmp.eq.s32.totalorder %v98_v16, %v1366_v56  ;;  %v1141_v16 = vld [vmem:[%s1544_s7 + $0x8] sm:$0xff] }
  0x9c   :  { %v107_v20 = vpop.permute.xlu2 %106 }
  0x9d   :  { %v226_v7 = vpop.permute.xlu0 %225  ;;  %v77_v8 = vpop.permute.xlu1 %76 }
  0x9e   :  { %vm242_vm0 = vcmp.eq.s32.totalorder %v226_v7, %v1366_v56  ;;  %vm123_vm1 = vcmp.eq.s32.totalorder %v77_v8, %v1366_v56 }
  0x9f   :  { %vm1392_vm3 = vmpackc.low %vm242_vm0, %vm241_vm15 }
  0xa0   :  { %vm999_vm4 = vmpackc.low %vm124_vm2, %vm123_vm1  ;;  %1052 = vmatmul.msk.bf16.gmra.mxu1 %vm1051_vm14, %v1158_v60  ;;  %vm236_vm14 = vcmp.eq.s32.totalorder %v208_v1, %v1366_v56  ;;  %vm127_vm1 = vcmp.eq.s32.totalorder %v89_v14, %v1366_v56 }
  0xa1   :  { %1000 = vmatmul.msk.bf16.vlgmr.msra.gmra.mxu0 %vm999_vm4, %v1158_v60  ;;  %vm1055_vm0 = vmpackc.low %vm236_vm14, %vm235_vm13  ;;  %vm133_vm13 = vcmp.eq.s32.totalorder %v107_v20, %v1366_v56 }
  0xa4   :  { %v116_v24 = vpop.permute.xlu2 %115 }
  0xa5   :  { %v83_v11 = vpop.permute.xlu0 %82  ;;  %v86_v12 = vpop.permute.xlu1 %85  ;;  %vm136_vm14 = vcmp.eq.s32.totalorder %v116_v24, %v1366_v56  ;;  %v1485_v24 = vld [vmem:[%s1543_s6] ss:$0 sm:$0xff] }
  0xa6   :  { %vm125_vm8 = vcmp.eq.s32.totalorder %v83_v11, %v1366_v56  ;;  %vm126_vm9 = vcmp.eq.s32.totalorder %v86_v12, %v1366_v56  ;;  %v1143_v12 = vld [vmem:[%s1544_s7 + $0x18] sm:$0xff] }
  0xa7   :  { %vm1001_vm12 = vmpackc.low %vm126_vm9, %vm125_vm8  ;;  %813 = vmatpush.bf16.msrb.mxu2 %v1143_v12 }
  0xad   :  { %v92_v13 = vpop.permute.xlu0 %91  ;;  %v95_v15 = vpop.permute.xlu1 %94 }
  0xae   :  { %vm128_vm15 = vcmp.eq.s32.totalorder %v92_v13, %v1366_v56  ;;  %vm129_vm4 = vcmp.eq.s32.totalorder %v95_v15, %v1366_v56  ;;  %v1142_v13 = vld [vmem:[%s1544_s7 + $0x10] sm:$0xff] }
  0xaf   :  { %vm1003_vm2 = vmpackc.low %vm128_vm15, %vm127_vm1  ;;  %814 = vmatpush.bf16.msrb.mxu2 %v1142_v13 }
  0xb0   :  { %1054 = vmatmul.msk.bf16.gmra.mxu1 %vm1053_vm10, %v1158_v60  ;;  %vm1005_vm6 = vmpackc.low %vm130_vm5, %vm129_vm4  ;;  %vm784_vm4 = vcmask 523264  }
  0xb1   :  { %1002 = vmatmul.msk.bf16.gmra.mxu0 %vm1001_vm12, %v1158_v60 }
  0xb3   :  { %815 = vmatpush.bf16.msrb.mxu2 %v1141_v16 }
  0xb5   :  { %v101_v17 = vpop.permute.xlu0 %100  ;;  %v104_v18 = vpop.permute.xlu1 %103 }
  0xb6   :  { %vm131_vm8 = vcmp.eq.s32.totalorder %v101_v17, %v1366_v56  ;;  %vm132_vm9 = vcmp.eq.s32.totalorder %v104_v18, %v1366_v56  ;;  %v1140_v18 = vld [vmem:[%s1544_s7] sm:$0xff] }
  0xb7   :  { %vm1007_vm10 = vmpackc.low %vm132_vm9, %vm131_vm8  ;;  %816 = vmatpush.bf16.msrb.mxu2 %v1140_v18 }
  0xbd   :  { %v110_v19 = vpop.permute.xlu0 %109  ;;  %v113_v23 = vpop.permute.xlu1 %112 }
  0xbe   :  { %vm134_vm12 = vcmp.eq.s32.totalorder %v110_v19, %v1366_v56 }
  0xc0   :  { %1056 = vmatmul.msk.bf16.gmra.mxu1 %vm1055_vm0, %v1158_v60 }
  0xc1   :  { %1004 = vmatmul.msk.bf16.gmra.mxu0 %vm1003_vm2, %v1158_v60  ;;  %vm545_vm2 = vcmask 261120  }
  0xc5   :  { %v119_v27 = vpop.permute.xlu0 %118  ;;  %v122_v28 = vpop.permute.xlu1 %121 }
  0xc6   :  { %vm137_vm15 = vcmp.eq.s32.totalorder %v119_v27, %v1366_v56  ;;  %vm138_vm0 = vcmp.eq.s32.totalorder %v122_v28, %v1366_v56 }
  0xc7   :  { %vm1013_vm1 = vmpackc.low %vm138_vm0, %vm137_vm15 }
  0xd0   :  { %1058 = vmatmul.msk.bf16.gmra.mxu1 %vm1375_vm7, %v1158_v60  ;;  %vm1009_vm7 = vmpackc.low %vm134_vm12, %vm133_vm13 }
  0xd1   :  { %1006 = vmatmul.msk.bf16.gmra.mxu0 %vm1005_vm6, %v1158_v60 }
  0xe0   :  { %1060 = vmatmul.msk.bf16.gmra.mxu1 %vm1382_vm11, %v1158_v60  ;;  %vm135_vm11 = vcmp.eq.s32.totalorder %v113_v23, %v1366_v56 }
  0xe1   :  { %1008 = vmatmul.msk.bf16.gmra.mxu0 %vm1007_vm10, %v1158_v60 }
  0xf0   :  { %1062 = vmatmul.msk.bf16.gmra.mxu1 %vm1392_vm3, %v1158_v60  ;;  %vm1011_vm3 = vmpackc.low %vm136_vm14, %vm135_vm11 }
  0xf1   :  { %1010 = vmatmul.msk.bf16.gmra.mxu0 %vm1009_vm7, %v1158_v60 }
  0xfd   :  { %v477_v25 = vpop.f32.mrf.mxu1 }
 0x101   :  { %1012 = vmatmul.msk.bf16.gmra.mxu0 %vm1011_vm3, %v1158_v60 }
 0x105   :  { %v479_v26 = vpop.f32.mrf.mxu1 }
 0x106   :  { %v517_v33 = vpack.c.bf16 %v479_v26, %v477_v25 }
 0x10d   :  { %v482_v29 = vpop.f32.mrf.mxu1 }
 0x111   :  { %1014 = vmatmul.msk.bf16.gmra.mxu0 %vm1013_vm1, %v1158_v60 }
 0x115   :  { %v484_v30 = vpop.f32.mrf.mxu1 }
 0x116   :  { %v518_v31 = vpack.c.bf16 %v484_v30, %v482_v29 }
 0x118   :  { %1072 = vmatmul.msk.bf16.vlgmr.msrb.gmra.mxu1 %vm545_vm2, %v518_v31 }
 0x11d   :  { %v487_v32 = vpop.f32.mrf.mxu1 }
 0x11e   :  { %v356_v45 = vpop.f32.mrf.mxu0 }
 0x121   :  { %1071 = vmatmul.msk.bf16.vlgmr.msrb.gmra.mxu0 %vm545_vm2, %v517_v33 }
 0x125   :  { %v489_v34 = vpop.f32.mrf.mxu1 }
 0x126   :  { %v519_v35 = vpack.c.bf16 %v489_v34, %v487_v32  ;;  %v358_v51 = vpop.f32.mrf.mxu0 }
 0x127   :  { %v396_v58 = vpack.c.bf16 %v358_v51, %v356_v45 }
 0x128   :  { %1073 = vmatmul.msk.bf16.gmra.mxu1 %vm545_vm2, %v519_v35 }
 0x12d   :  { %v492_v36 = vpop.f32.mrf.mxu1 }
 0x12e   :  { %v361_v53 = vpop.f32.mrf.mxu0 }
 0x135   :  { %v494_v37 = vpop.f32.mrf.mxu1 }
 0x136   :  { %v520_v38 = vpack.c.bf16 %v494_v37, %v492_v36  ;;  %v363_v56 = vpop.f32.mrf.mxu0 }
 0x137   :  { %v397_v60 = vpack.c.bf16 %v363_v56, %v361_v53 }
 0x138   :  { %1074 = vmatmul.msk.bf16.vlgmr.msra.gmra.mxu2 %vm545_vm2, %v520_v38 }
 0x13d   :  { %v497_v39 = vpop.f32.mrf.mxu1 }
 0x13e   :  { %v366_v57 = vpop.f32.mrf.mxu0 }
 0x145   :  { %v499_v40 = vpop.f32.mrf.mxu1 }
 0x146   :  { %v521_v41 = vpack.c.bf16 %v499_v40, %v497_v39  ;;  %v368_v59 = vpop.f32.mrf.mxu0 }
 0x147   :  { %v398_v63 = vpack.c.bf16 %v368_v59, %v366_v57 }
 0x148   :  { %1075 = vmatmul.msk.bf16.gmra.mxu2 %vm545_vm2, %v521_v41 }
 0x14d   :  { %v502_v42 = vpop.f32.mrf.mxu1 }
 0x14e   :  { %v371_v61 = vpop.f32.mrf.mxu0 }
 0x155   :  { %v504_v43 = vpop.f32.mrf.mxu1 }
 0x156   :  { %v522_v44 = vpack.c.bf16 %v504_v43, %v502_v42  ;;  %v373_v62 = vpop.f32.mrf.mxu0 }
 0x157   :  { %v399_v1 = vpack.c.bf16 %v373_v62, %v371_v61 }
 0x158   :  { %1076 = vmatmul.msk.bf16.gmra.mxu2 %vm545_vm2, %v522_v44 }
 0x15d   :  { %v507_v46 = vpop.f32.mrf.mxu1 }
 0x15e   :  { %v376_v0 = vpop.f32.mrf.mxu0 }
 0x165   :  { %v509_v49 = vpop.f32.mrf.mxu1 }
 0x166   :  { %v523_v50 = vpack.c.bf16 %v509_v49, %v507_v46  ;;  %v378_v2 = vpop.f32.mrf.mxu0 }
 0x167   :  { %v400_v4 = vpack.c.bf16 %v378_v2, %v376_v0 }
 0x168   :  { %1077 = vmatmul.msk.bf16.vlgmr.msra.gmra.mxu3 %vm545_vm2, %v523_v50 }
 0x16d   :  { %v512_v52 = vpop.f32.mrf.mxu1 }
 0x16e   :  { %v381_v3 = vpop.f32.mrf.mxu0 }
 0x175   :  { %v514_v54 = vpop.f32.mrf.mxu1 }
 0x176   :  { %v524_v55 = vpack.c.bf16 %v514_v54, %v512_v52  ;;  %v383_v5 = vpop.f32.mrf.mxu0 }
 0x177   :  { %v401_v7 = vpack.c.bf16 %v383_v5, %v381_v3 }
 0x178   :  { %1078 = vmatmul.msk.bf16.gmra.mxu3 %vm545_vm2, %v524_v55 }
 0x17e   :  { %v386_v6 = vpop.f32.mrf.mxu0 }
 0x186   :  { %v388_v8 = vpop.f32.mrf.mxu0 }
 0x187   :  { %v402_v9 = vpack.c.bf16 %v388_v8, %v386_v6 }
 0x188   :  { %1087 = vmatmul.msk.bf16.vlgmr.msrb.gmra.mxu3 %vm545_vm2, %v396_v58 }
 0x18e   :  { %v391_v10 = vpop.f32.mrf.mxu0 }
 0x195   :  { %v584_v29 = vpop.f32.mrf.mxu1 }
 0x196   :  { %v393_v14 = vpop.f32.mrf.mxu0 }
 0x197   :  { %v403_v17 = vpack.c.bf16 %v393_v14, %v391_v10 }
 0x198   :  { %1088 = vmatmul.msk.bf16.gmra.mxu3 %vm545_vm2, %v397_v60 }
 0x19d   :  { %v586_v35 = vpop.f32.mrf.mxu1 }
 0x19e   :  { %v579_v21 = vpop.f32.mrf.mxu0 }
 0x1a5   :  { %v589_v43 = vpop.f32.mrf.mxu1 }
 0x1a6   :  { %v581_v25 = vpop.f32.mrf.mxu0 }
 0x1a8   :  { %1089 = vmatmul.msk.bf16.gmra.mxu3 %vm545_vm2, %v398_v63 }
 0x1ad   :  { %v591_v48 = vpop.f32.mrf.mxu1 }
 0x1b8   :  { %1090 = vmatmul.msk.bf16.gmra.mxu3 %vm545_vm2, %v399_v1 }
 0x1bb   :  { %v594_v47 = vpop.f32.mrf.mxu2 }
 0x1c3   :  { %v596_v56 = vpop.f32.mrf.mxu2 }
 0x1c8   :  { %1091 = vmatmul.msk.bf16.gmra.mxu3 %vm545_vm2, %v400_v4 }
 0x1cb   :  { %v599_v62 = vpop.f32.mrf.mxu2 }
 0x1d3   :  { %v601_v4 = vpop.f32.mrf.mxu2 }
 0x1d8   :  { %1092 = vmatmul.msk.bf16.gmra.mxu3 %vm545_vm2, %v401_v7 }
 0x1db   :  { %v604_v13 = vpop.f32.mrf.mxu2 }
 0x1e3   :  { %v606_v18 = vpop.f32.mrf.mxu2 }
 0x1e8   :  { %1093 = vmatmul.msk.bf16.gmra.mxu3 %vm545_vm2, %v402_v9 }
 0x1eb   :  { %v1461_v11 = vpop.f32.mrf.mxu3 }
 0x1f3   :  { %v1469_v15 = vpop.f32.mrf.mxu3 }
 0x1f8   :  { %1094 = vmatmul.msk.bf16.gmra.mxu3 %vm545_vm2, %v403_v17 }
 0x1fb   :  { %v1478_v19 = vpop.f32.mrf.mxu3 }
 0x203   :  { %v1480_v20 = vpop.f32.mrf.mxu3 }
 0x20b   :  { %v664_v22 = vpop.f32.mrf.mxu3 }
 0x20c   :  { %v665_v23 = vadd.f32 %v664_v22, %v579_v21 }
 0x20e   :  { %v708_v27 = vadd.f32 %v1485_v24, %v665_v23 }
 0x210   :  { %v724_v31 = vmax.f32 %v708_v27, 0.0 }
 0x213   :  { %v666_v26 = vpop.f32.mrf.mxu3 }
 0x214   :  { %v667_v28 = vadd.f32 %v666_v26, %v581_v25 }
 0x216   :  { %v709_v30 = vadd.f32 %v1485_v24, %v667_v28 }
 0x218   :  { %v725_v32 = vmax.f32 %v709_v30, 0.0 }
 0x21a   :  { %v740_v33 = vpack.c.bf16 %v725_v32, %v724_v31 }
 0x21b   :  { %v669_v34 = vpop.f32.mrf.mxu3 }
 0x21c   :  { %1111 = vmatmul.msk.bf16.vlgmr.msrb.gmra.mxu2 %vm784_vm4, %v740_v33  ;;  %v670_v36 = vadd.f32 %v669_v34, %v584_v29 }
 0x21e   :  { %v710_v38 = vadd.f32 %v1485_v24, %v670_v36 }
 0x220   :  { %v726_v41 = vmax.f32 %v710_v38, 0.0 }
 0x223   :  { %v671_v37 = vpop.f32.mrf.mxu3 }
 0x224   :  { %v672_v39 = vadd.f32 %v671_v37, %v586_v35 }
 0x226   :  { %v711_v40 = vadd.f32 %v1485_v24, %v672_v39 }
 0x228   :  { %v727_v42 = vmax.f32 %v711_v40, 0.0 }
 0x22a   :  { %v741_v44 = vpack.c.bf16 %v727_v42, %v726_v41 }
 0x22b   :  { %v674_v45 = vpop.f32.mrf.mxu3 }
 0x22c   :  { %1112 = vmatmul.msk.bf16.gmra.mxu2 %vm784_vm4, %v741_v44  ;;  %v675_v46 = vadd.f32 %v674_v45, %v589_v43 }
 0x22e   :  { %v712_v50 = vadd.f32 %v1485_v24, %v675_v46  ;;  %v1156_v46 = vld [vmem:[%s1545_s8] ss:$0 sm:$0xff] }
 0x230   :  { %v728_v53 = vmax.f32 %v712_v50, 0.0 }
 0x233   :  { %v676_v49 = vpop.f32.mrf.mxu3 }
 0x234   :  { %v677_v51 = vadd.f32 %v676_v49, %v591_v48 }
 0x236   :  { %v713_v52 = vadd.f32 %v1485_v24, %v677_v51 }
 0x238   :  { %v729_v54 = vmax.f32 %v713_v52, 0.0 }
 0x23a   :  { %v742_v55 = vpack.c.bf16 %v729_v54, %v728_v53 }
 0x23b   :  { %v679_v57 = vpop.f32.mrf.mxu3 }
 0x23c   :  { %1113 = vmatmul.msk.bf16.gmra.mxu2 %vm784_vm4, %v742_v55  ;;  %v680_v58 = vadd.f32 %v679_v57, %v594_v47 }
 0x23e   :  { %v714_v60 = vadd.f32 %v1485_v24, %v680_v58 }
 0x240   :  { %v730_v0 = vmax.f32 %v714_v60, 0.0 }
 0x243   :  { %v681_v59 = vpop.f32.mrf.mxu3 }
 0x244   :  { %v682_v61 = vadd.f32 %v681_v59, %v596_v56 }
 0x246   :  { %v715_v63 = vadd.f32 %v1485_v24, %v682_v61 }
 0x248   :  { %v731_v1 = vmax.f32 %v715_v63, 0.0 }
 0x24a   :  { %v743_v2 = vpack.c.bf16 %v731_v1, %v730_v0 }
 0x24b   :  { %v684_v3 = vpop.f32.mrf.mxu3 }
 0x24c   :  { %1114 = vmatmul.msk.bf16.gmra.mxu2 %vm784_vm4, %v743_v2  ;;  %v685_v5 = vadd.f32 %v684_v3, %v599_v62 }
 0x24e   :  { %v716_v7 = vadd.f32 %v1485_v24, %v685_v5 }
 0x250   :  { %v732_v10 = vmax.f32 %v716_v7, 0.0 }
 0x253   :  { %v686_v6 = vpop.f32.mrf.mxu3 }
 0x254   :  { %v687_v8 = vadd.f32 %v686_v6, %v601_v4 }
 0x256   :  { %v717_v9 = vadd.f32 %v1485_v24, %v687_v8 }
 0x258   :  { %v733_v12 = vmax.f32 %v717_v9, 0.0 }
 0x25a   :  { %v744_v14 = vpack.c.bf16 %v733_v12, %v732_v10 }
 0x25b   :  { %v689_v16 = vpop.f32.mrf.mxu3 }
 0x25c   :  { %1115 = vmatmul.msk.bf16.gmra.mxu2 %vm784_vm4, %v744_v14  ;;  %v690_v17 = vadd.f32 %v689_v16, %v604_v13 }
 0x25e   :  { %v718_v22 = vadd.f32 %v1485_v24, %v690_v17 }
 0x260   :  { %v734_v26 = vmax.f32 %v718_v22, 0.0 }
 0x263   :  { %v691_v21 = vpop.f32.mrf.mxu3 }
 0x264   :  { %v692_v23 = vadd.f32 %v691_v21, %v606_v18 }
 0x266   :  { %v719_v25 = vadd.f32 %v1485_v24, %v692_v23 }
 0x268   :  { %v735_v27 = vmax.f32 %v719_v25, 0.0 }
 0x26a   :  { %v745_v28 = vpack.c.bf16 %v735_v27, %v734_v26 }
 0x26b   :  { %v694_v29 = vpop.f32.mrf.mxu3 }
 0x26c   :  { %1116 = vmatmul.msk.bf16.gmra.mxu2 %vm784_vm4, %v745_v28  ;;  %v695_v30 = vadd.f32 %v694_v29, %v1461_v11 }
 0x26e   :  { %v720_v32 = vadd.f32 %v1485_v24, %v695_v30 }
 0x270   :  { %v736_v35 = vmax.f32 %v720_v32, 0.0 }
 0x273   :  { %v696_v31 = vpop.f32.mrf.mxu3 }
 0x274   :  { %v697_v33 = vadd.f32 %v696_v31, %v1469_v15 }
 0x276   :  { %v721_v34 = vadd.f32 %v1485_v24, %v697_v33 }
 0x278   :  { %v737_v36 = vmax.f32 %v721_v34, 0.0 }
 0x27a   :  { %v746_v37 = vpack.c.bf16 %v737_v36, %v736_v35 }
 0x27b   :  { %v699_v38 = vpop.f32.mrf.mxu3 }
 0x27c   :  { %1117 = vmatmul.msk.bf16.gmra.mxu2 %vm784_vm4, %v746_v37  ;;  %v700_v39 = vadd.f32 %v699_v38, %v1478_v19 }
 0x27e   :  { %v722_v41 = vadd.f32 %v1485_v24, %v700_v39 }
 0x280   :  { %v738_v43 = vmax.f32 %v722_v41, 0.0 }
 0x283   :  { %v701_v40 = vpop.f32.mrf.mxu3 }
 0x284   :  { %v702_v11 = vadd.f32 %v701_v40, %v1480_v20 }
 0x286   :  { %v723_v42 = vadd.f32 %v1485_v24, %v702_v11 }
 0x288   :  { %v739_v44 = vmax.f32 %v723_v42, 0.0 }
 0x28a   :  { %v747_v15 = vpack.c.bf16 %v739_v44, %v738_v43 }
 0x28c   :  { %1118 = vmatmul.msk.bf16.gmra.mxu2 %vm784_vm4, %v747_v15 }
 0x29f   :  { %v818_v45 = vpop.f32.mrf.mxu2 }
 0x2a0   :  { %v819_v47 = vadd.f32 %v1156_v46, %v818_v45 }
 0x2a2   :  { %v858_v49 = vmax.f32 %v819_v47, 0.0  ;;  %v887_v47 = vpop.permute.xlu2 %886 }
 0x2a7   :  { %v820_v48 = vpop.f32.mrf.mxu2 }
 0x2a8   :  { %v821_v19 = vadd.f32 %v1156_v46, %v820_v48  ;;  %v889_v48 = vperm.slane %v887_v47, 0 }
 0x2aa   :  { %v859_v50 = vmax.f32 %v821_v19, 0.0 }
 0x2ac   :  { %v1518_v51 = vpack.c.bf16 %v859_v50, %v858_v49 }
 0x2ae   :  { %v894_v45 = vsel %vm545_vm2, %v1518_v51, 0 }
 0x2af   :  { %v823_v20 = vpop.f32.mrf.mxu2 }
 0x2b0   :  { %v824_v52 = vadd.f32 %v1156_v46, %v823_v20 }
 0x2b2   :  { %v860_v54 = vmax.f32 %v824_v52, 0.0 }
 0x2b7   :  { %v825_v24 = vpop.f32.mrf.mxu2 }
 0x2b8   :  { %v826_v53 = vadd.f32 %v1156_v46, %v825_v24 }
 0x2ba   :  { %v861_v55 = vmax.f32 %v826_v53, 0.0 }
 0x2bc   :  { %v875_v56 = vpack.c.bf16 %v861_v55, %v860_v54 }
 0x2be   :  { %v897_v15 = vsel %vm545_vm2, %v875_v56, 0 }
 0x2bf   :  { %v828_v57 = vpop.f32.mrf.mxu2 }
 0x2c0   :  { %v829_v58 = vadd.f32 %v1156_v46, %v828_v57 }
 0x2c2   :  { %v862_v61 = vmax.f32 %v829_v58, 0.0 }
 0x2c7   :  { %v830_v59 = vpop.f32.mrf.mxu2 }
 0x2c8   :  { %v831_v60 = vadd.f32 %v1156_v46, %v830_v59 }
 0x2ca   :  { %v863_v62 = vmax.f32 %v831_v60, 0.0 }
 0x2cc   :  { %v876_v63 = vpack.c.bf16 %v863_v62, %v862_v61 }
 0x2ce   :  { %v900_v44 = vsel %vm545_vm2, %v876_v63, 0 }
 0x2cf   :  { %v833_v0 = vpop.f32.mrf.mxu2 }
 0x2d0   :  { %v834_v1 = vadd.f32 %v1156_v46, %v833_v0 }
 0x2d2   :  { %v864_v4 = vmax.f32 %v834_v1, 0.0 }
 0x2d7   :  { %v835_v2 = vpop.f32.mrf.mxu2 }
 0x2d8   :  { %v836_v3 = vadd.f32 %v1156_v46, %v835_v2 }
 0x2da   :  { %v865_v5 = vmax.f32 %v836_v3, 0.0 }
 0x2dc   :  { %v877_v6 = vpack.c.bf16 %v865_v5, %v864_v4 }
 0x2de   :  { %v903_v43 = vsel %vm545_vm2, %v877_v6, 0 }
 0x2df   :  { %v838_v7 = vpop.f32.mrf.mxu2 }
 0x2e0   :  { %v839_v8 = vadd.f32 %v1156_v46, %v838_v7 }
 0x2e2   :  { %v866_v12 = vmax.f32 %v839_v8, 0.0 }
 0x2e7   :  { %v840_v9 = vpop.f32.mrf.mxu2 }
 0x2e8   :  { %v841_v10 = vadd.f32 %v1156_v46, %v840_v9 }
 0x2ea   :  { %v867_v13 = vmax.f32 %v841_v10, 0.0 }
 0x2ec   :  { %v878_v14 = vpack.c.bf16 %v867_v13, %v866_v12 }
 0x2ee   :  { %v906_v42 = vsel %vm545_vm2, %v878_v14, 0 }
 0x2ef   :  { %v843_v16 = vpop.f32.mrf.mxu2 }
 0x2f0   :  { %v844_v37 = vadd.f32 %v1156_v46, %v843_v16 }
 0x2f2   :  { %v868_v40 = vmax.f32 %v844_v37, 0.0 }
 0x2f7   :  { %v845_v17 = vpop.f32.mrf.mxu2 }
 0x2f8   :  { %v846_v35 = vadd.f32 %v1156_v46, %v845_v17 }
 0x2fa   :  { %v869_v38 = vmax.f32 %v846_v35, 0.0 }
 0x2fc   :  { %v879_v41 = vpack.c.bf16 %v869_v38, %v868_v40 }
 0x2fe   :  { %v909_v11 = vsel %vm545_vm2, %v879_v41, 0 }
 0x2ff   :  { %v848_v18 = vpop.f32.mrf.mxu2 }
 0x300   :  { %v849_v30 = vadd.f32 %v1156_v46, %v848_v18 }
 0x302   :  { %v870_v34 = vmax.f32 %v849_v30, 0.0 }
 0x307   :  { %v850_v21 = vpop.f32.mrf.mxu2 }
 0x308   :  { %v851_v27 = vadd.f32 %v1156_v46, %v850_v21 }
 0x30a   :  { %v871_v32 = vmax.f32 %v851_v27, 0.0 }
 0x30c   :  { %v880_v36 = vpack.c.bf16 %v871_v32, %v870_v34 }
 0x30e   :  { %v912_v39 = vsel %vm545_vm2, %v880_v36, 0 }
 0x30f   :  { %v853_v22 = vpop.f32.mrf.mxu2 }
 0x310   :  { %v854_v23 = vadd.f32 %v1156_v46, %v853_v22 }
 0x312   :  { %v872_v28 = vmax.f32 %v854_v23, 0.0 }
 0x317   :  { %v855_v25 = vpop.f32.mrf.mxu2 }
 0x318   :  { %v856_v26 = vadd.f32 %v1156_v46, %v855_v25  ;;  %v882_v46 = vld [vmem:[%s1546_s9] sm:$0x1] }
 0x31a   :  { %v873_v29 = vmax.f32 %v856_v26, 0.0 }
 0x31c   :  { %v881_v31 = vpack.c.bf16 %v873_v29, %v872_v28 }
 0x31e   :  { %v915_v33 = vsel %vm545_vm2, %v881_v31, 0 }
 0x31f   :  { %917 = vmatpush.bf16.xpose.msra.mxu3 %v915_v33 }
 0x327   :  { %918 = vmatpush.bf16.xpose.msra.mxu3 %v912_v39 }
 0x32f   :  { %919 = vmatpush.bf16.xpose.msra.mxu3 %v909_v11 }
 0x337   :  { %920 = vmatpush.bf16.xpose.msra.mxu3 %v906_v42 }
 0x33f   :  { %921 = vmatpush.bf16.xpose.msra.mxu3 %v903_v43 }
 0x347   :  { %922 = vmatpush.bf16.xpose.msra.mxu3 %v900_v44 }
 0x34f   :  { %923 = vmatpush.bf16.xpose.msra.mxu3 %v897_v15 }
 0x357   :  { %924 = vmatpush.bf16.xpose.msra.mxu3 %v894_v45 }
 0x35e   :  { %1119 = vmatmul.msk.bf16.vlgmr.msra.gmra.mxu3 %vm545_vm2, %v882_v46 }
 0x3e1   :  { %v926_v19 = vpop.f32.mrf.mxu3 }
 0x3e2   :  { %v927_v49 = vadd.f32 %v926_v19, %v889_v48 }
 0x3e4   :  { %930 = vst [vmem:[%s1547_s11] sm:$0x1] %v927_v49 }
 0x3e9   :  { %v928_v50 = vpop.f32.mrf.mxu3 }

</bundles_post_ra>
